<compile_context>
chip_gen: v7x
topology: tpu7x:2x2x1
jax: 0.10.0
libtpu: 0.0.40
codegen_flags: <defaults>
</compile_context>

<pallas_src>
import functools

import jax
import jax.numpy as jnp
from jax.experimental import pallas as pl
from jax.experimental.pallas import tpu as pltpu


def _round_up(n, m):
    return ((n + m - 1) // m) * m


def titanic_mlp_kernel(x_ref, p_ref, o_ref, *, d, h1, h2, od):
    # x_ref: (d, Bt) f32 -- batch on the 128-wide lane axis.
    # p_ref: (8, 128) f32 -- packed [w1|b1|w2|b2|w3|b3] at static column offsets.
    x = x_ref[...]
    P = p_ref[...]

    off = 0
    w1 = P[0:h1, off:off + d];  off += d      # (h1, d)
    b1 = P[0:h1, off:off + 1];  off += 1      # (h1, 1)
    w2 = P[0:h2, off:off + h1]; off += h1     # (h2, h1)
    b2 = P[0:h2, off:off + 1];  off += 1      # (h2, 1)
    w3 = P[0:od, off:off + h2]; off += h2     # (od, h2)
    b3 = P[0:od, off:off + 1]                 # (od, 1)

    # fc1 + ReLU on the MXU (the only layer worth a matmul): (h1,d)@(d,Bt) -> (h1,Bt)
    a1 = jnp.dot(w1, x, preferred_element_type=jnp.float32) + b1
    a1 = jnp.maximum(a1, 0.0)

    # fc2 + ReLU on the VPU: outer-product accumulation, no MXU pushes.
    a2 = b2 + w2[:, 0:1] * a1[0:1, :]
    for k in range(1, h1):
        a2 = a2 + w2[:, k:k + 1] * a1[k:k + 1, :]
    a2 = jnp.maximum(a2, 0.0)

    # fc3 + Sigmoid: VPU multiply-adds; the transcendental lands on the EUP slot.
    z = b3 + w3[:, 0:1] * a2[0:1, :]
    for k in range(1, h2):
        z = z + w3[:, k:k + 1] * a2[k:k + 1, :]
    o_ref[...] = jax.nn.sigmoid(z).astype(o_ref.dtype)


def _pack_params(w1, b1, w2, b2, w3, b3):
    """Pack all params into one (8, 128) f32 block with static column offsets."""
    h1, d = w1.shape
    h2 = w2.shape[0]
    od = w3.shape[0]
    n_cols = d + 1 + h1 + 1 + h2 + 1
    assert max(h1, h2, od) <= 8 and n_cols <= 128, "params do not fit one (8,128) block"

    P = jnp.zeros((8, 128), jnp.float32)
    off = 0
    P = P.at[:h1, off:off + d].set(w1.astype(jnp.float32)); off += d
    P = P.at[:h1, off:off + 1].set(jnp.reshape(b1, (h1, 1)).astype(jnp.float32)); off += 1
    P = P.at[:h2, off:off + h1].set(w2.astype(jnp.float32)); off += h1
    P = P.at[:h2, off:off + 1].set(jnp.reshape(b2, (h2, 1)).astype(jnp.float32)); off += 1
    P = P.at[:od, off:off + h2].set(w3.astype(jnp.float32)); off += h2
    P = P.at[:od, off:off + 1].set(jnp.reshape(b3, (od, 1)).astype(jnp.float32))
    return P, (d, h1, h2, od)


def titanic_net(x, params, *, b_tile_cap=32768, min_tile=8192, target_steps=8):
    """x: (B, input_dim) float32; params: w1,b1,w2,b2,w3,b3 in PyTorch layout
    (weights (out,in), biases (out,1))."""
    B, D = x.shape
    P, (d, h1, h2, od) = _pack_params(params["w1"], params["b1"], params["w2"],
                                      params["b2"], params["w3"], params["b3"])
    assert d == D

    # Batch padded only to the next 128 lanes; grid uses a partial last block.
    b_pad = _round_up(B, 128)
    # Tile choice: big enough (>= min_tile lanes) to amortize the ~0.35us/step grid
    # overhead, capped for VMEM, and ~b_pad/target_steps so large B still yields
    # enough grid steps for v7x's two TensorCores.
    tile_for_grid = _round_up(pl.cdiv(b_pad, target_steps), 128)
    b_tile = min(b_pad, b_tile_cap, max(min_tile, tile_for_grid))
    grid = pl.cdiv(b_pad, b_tile)

    # Layout shuffle in the wrapper: batch -> lanes. (One XLA copy; BlockSpec DMAs
    # cannot transpose, and a sublane-major layout would make the tiny contractions
    # the binding unit inside the kernel.)
    xt = jnp.zeros((D, b_pad), jnp.float32).at[:, :B].set(x.T.astype(jnp.float32))

    kernel = functools.partial(titanic_mlp_kernel, d=d, h1=h1, h2=h2, od=od)

    out_t = pl.pallas_call(
        kernel,
        out_shape=jax.ShapeDtypeStruct((od, b_pad), jnp.float32),
        grid=(grid,),
        in_specs=[
            pl.BlockSpec((D, b_tile), lambda i: (0, i)),   # x tile: lane-dense DMA
            pl.BlockSpec((8, 128), lambda i: (0, 0)),      # packed params: VMEM-resident
        ],
        out_specs=pl.BlockSpec((od, b_tile), lambda i: (0, i)),  # lane-dense stores
        compiler_params=pltpu.CompilerParams(dimension_semantics=("parallel",)),
    )(xt, P)

    return out_t[:, :B].T  # back to (B, out_dim)


def init_params(key, input_dim=12, h1=8, h2=4, out_dim=1):
    """PyTorch nn.Linear default init (uniform +/- 1/sqrt(fan_in)), PyTorch layout:
    weights (out_features, in_features), biases (out_features, 1)."""
    ks = jax.random.split(key, 6)

    def lin(kw, kb, fan_in, fan_out):
        bound = 1.0 / (fan_in ** 0.5)
        w = jax.random.uniform(kw, (fan_out, fan_in), jnp.float32, -bound, bound)
        b = jax.random.uniform(kb, (fan_out, 1), jnp.float32, -bound, bound)
        return w, b

    w1, b1 = lin(ks[0], ks[1], input_dim, h1)
    w2, b2 = lin(ks[2], ks[3], h1, h2)
    w3, b3 = lin(ks[4], ks[5], h2, out_dim)
    return dict(w1=w1, b1=b1, w2=w2, b2=b2, w3=w3, b3=b3)


def titanic_net_ref(x, p):
    """Pure-JAX reference of the same forward pass (batch-major layout)."""
    h = jnp.maximum(x @ p["w1"].T + p["b1"].T, 0.0)
    h = jnp.maximum(h @ p["w2"].T + p["b2"].T, 0.0)
    return jax.nn.sigmoid(h @ p["w3"].T + p["b3"].T)


if __name__ == "__main__":
    key = jax.random.PRNGKey(0)
    k_param, k_x = jax.random.split(key)

    batch, input_dim = 8, 12
    params = init_params(k_param, input_dim=input_dim)
    x = jax.random.normal(k_x, (batch, input_dim), jnp.float32)

    out = jax.block_until_ready(titanic_net(x, params))
    ref = titanic_net_ref(x, params)

    assert out.shape == (batch, 1), out.shape
    assert jnp.allclose(out, ref, atol=1e-5, rtol=1e-5), (out, ref)

    print("KERNEL_OK")
</pallas_src>

<mosaic_0001>
module attributes {stable_mosaic.version = 11 : i64} {
  func.func @titanic_mlp_kernel(%arg0: i32, %arg1: memref<12x128xf32, #tpu.memory_space<vmem>>, %arg2: memref<8x128xf32, #tpu.memory_space<vmem>>, %arg3: memref<1x128xf32, #tpu.memory_space<vmem>>) attributes {dimension_semantics = [#tpu.dimension_semantics<parallel>], iteration_bounds = array<i64: 1>, scalar_prefetch = 0 : i64, scratch_operands = 0 : i64, tpu.core_type = #tpu.core_type<tc>, window_params = [{transform_indices = @transform_0, window_bounds = array<i64: 12, 128>}, {pipeline_mode = #tpu.pipeline_mode<synchronous>, transform_indices = @transform_1, window_bounds = array<i64: 8, 128>}, {transform_indices = @transform_2, window_bounds = array<i64: 1, 128>}]} {
    %c0 = arith.constant 0 : index
    %c0_0 = arith.constant 0 : index
    %0 = vector.load %arg1[%c0, %c0_0] : memref<12x128xf32, #tpu.memory_space<vmem>>, vector<12x128xf32>
    %c0_1 = arith.constant 0 : index
    %c0_2 = arith.constant 0 : index
    %1 = vector.load %arg2[%c0_1, %c0_2] : memref<8x128xf32, #tpu.memory_space<vmem>>, vector<8x128xf32>
    %2 = vector.extract_strided_slice %1 {offsets = [0, 0], sizes = [8, 12], strides = [1, 1]} : vector<8x128xf32> to vector<8x12xf32>
    %3 = vector.extract_strided_slice %1 {offsets = [0, 12], sizes = [8, 1], strides = [1, 1]} : vector<8x128xf32> to vector<8x1xf32>
    %4 = vector.extract_strided_slice %1 {offsets = [0, 13], sizes = [4, 8], strides = [1, 1]} : vector<8x128xf32> to vector<4x8xf32>
    %5 = vector.extract_strided_slice %1 {offsets = [0, 21], sizes = [4, 1], strides = [1, 1]} : vector<8x128xf32> to vector<4x1xf32>
    %6 = vector.extract_strided_slice %1 {offsets = [0, 22], sizes = [1, 4], strides = [1, 1]} : vector<8x128xf32> to vector<1x4xf32>
    %7 = vector.extract_strided_slice %1 {offsets = [0, 26], sizes = [1, 1], strides = [1, 1]} : vector<8x128xf32> to vector<1x1xf32>
    %cst = arith.constant dense<0.000000e+00> : vector<8x128xf32>
    %8 = tpu.matmul %2, %0, %cst {dimension_numbers = #tpu.dot_dimension_numbers<[1], [0], [0], [1], [0, 0, 1, 1], [], []>} : vector<8x12xf32>, vector<12x128xf32>, vector<8x128xf32> -> vector<8x128xf32>
    %9 = vector.broadcast %3 : vector<8x1xf32> to vector<8x128xf32>
    %10 = arith.addf %8, %9 : vector<8x128xf32>
    %cst_3 = arith.constant 0.000000e+00 : f32
    %11 = vector.broadcast %cst_3 : f32 to vector<8x128xf32>
    %12 = arith.maximumf %10, %11 : vector<8x128xf32>
    %13 = vector.extract_strided_slice %4 {offsets = [0, 0], sizes = [4, 1], strides = [1, 1]} : vector<4x8xf32> to vector<4x1xf32>
    %14 = vector.extract_strided_slice %12 {offsets = [0, 0], sizes = [1, 128], strides = [1, 1]} : vector<8x128xf32> to vector<1x128xf32>
    %15 = vector.broadcast %13 : vector<4x1xf32> to vector<4x128xf32>
    %16 = vector.broadcast %14 : vector<1x128xf32> to vector<4x128xf32>
    %17 = arith.mulf %15, %16 : vector<4x128xf32>
    %18 = vector.broadcast %5 : vector<4x1xf32> to vector<4x128xf32>
    %19 = arith.addf %18, %17 : vector<4x128xf32>
    %20 = vector.extract_strided_slice %4 {offsets = [0, 1], sizes = [4, 1], strides = [1, 1]} : vector<4x8xf32> to vector<4x1xf32>
    %21 = vector.extract_strided_slice %12 {offsets = [1, 0], sizes = [1, 128], strides = [1, 1]} : vector<8x128xf32> to vector<1x128xf32>
    %22 = vector.broadcast %20 : vector<4x1xf32> to vector<4x128xf32>
    %23 = vector.broadcast %21 : vector<1x128xf32> to vector<4x128xf32>
    %24 = arith.mulf %22, %23 : vector<4x128xf32>
    %25 = arith.addf %19, %24 : vector<4x128xf32>
    %26 = vector.extract_strided_slice %4 {offsets = [0, 2], sizes = [4, 1], strides = [1, 1]} : vector<4x8xf32> to vector<4x1xf32>
    %27 = vector.extract_strided_slice %12 {offsets = [2, 0], sizes = [1, 128], strides = [1, 1]} : vector<8x128xf32> to vector<1x128xf32>
    %28 = vector.broadcast %26 : vector<4x1xf32> to vector<4x128xf32>
    %29 = vector.broadcast %27 : vector<1x128xf32> to vector<4x128xf32>
    %30 = arith.mulf %28, %29 : vector<4x128xf32>
    %31 = arith.addf %25, %30 : vector<4x128xf32>
    %32 = vector.extract_strided_slice %4 {offsets = [0, 3], sizes = [4, 1], strides = [1, 1]} : vector<4x8xf32> to vector<4x1xf32>
    %33 = vector.extract_strided_slice %12 {offsets = [3, 0], sizes = [1, 128], strides = [1, 1]} : vector<8x128xf32> to vector<1x128xf32>
    %34 = vector.broadcast %32 : vector<4x1xf32> to vector<4x128xf32>
    %35 = vector.broadcast %33 : vector<1x128xf32> to vector<4x128xf32>
    %36 = arith.mulf %34, %35 : vector<4x128xf32>
    %37 = arith.addf %31, %36 : vector<4x128xf32>
    %38 = vector.extract_strided_slice %4 {offsets = [0, 4], sizes = [4, 1], strides = [1, 1]} : vector<4x8xf32> to vector<4x1xf32>
    %39 = vector.extract_strided_slice %12 {offsets = [4, 0], sizes = [1, 128], strides = [1, 1]} : vector<8x128xf32> to vector<1x128xf32>
    %40 = vector.broadcast %38 : vector<4x1xf32> to vector<4x128xf32>
    %41 = vector.broadcast %39 : vector<1x128xf32> to vector<4x128xf32>
    %42 = arith.mulf %40, %41 : vector<4x128xf32>
    %43 = arith.addf %37, %42 : vector<4x128xf32>
    %44 = vector.extract_strided_slice %4 {offsets = [0, 5], sizes = [4, 1], strides = [1, 1]} : vector<4x8xf32> to vector<4x1xf32>
    %45 = vector.extract_strided_slice %12 {offsets = [5, 0], sizes = [1, 128], strides = [1, 1]} : vector<8x128xf32> to vector<1x128xf32>
    %46 = vector.broadcast %44 : vector<4x1xf32> to vector<4x128xf32>
    %47 = vector.broadcast %45 : vector<1x128xf32> to vector<4x128xf32>
    %48 = arith.mulf %46, %47 : vector<4x128xf32>
    %49 = arith.addf %43, %48 : vector<4x128xf32>
    %50 = vector.extract_strided_slice %4 {offsets = [0, 6], sizes = [4, 1], strides = [1, 1]} : vector<4x8xf32> to vector<4x1xf32>
    %51 = vector.extract_strided_slice %12 {offsets = [6, 0], sizes = [1, 128], strides = [1, 1]} : vector<8x128xf32> to vector<1x128xf32>
    %52 = vector.broadcast %50 : vector<4x1xf32> to vector<4x128xf32>
    %53 = vector.broadcast %51 : vector<1x128xf32> to vector<4x128xf32>
    %54 = arith.mulf %52, %53 : vector<4x128xf32>
    %55 = arith.addf %49, %54 : vector<4x128xf32>
    %56 = vector.extract_strided_slice %4 {offsets = [0, 7], sizes = [4, 1], strides = [1, 1]} : vector<4x8xf32> to vector<4x1xf32>
    %57 = vector.extract_strided_slice %12 {offsets = [7, 0], sizes = [1, 128], strides = [1, 1]} : vector<8x128xf32> to vector<1x128xf32>
    %58 = vector.broadcast %56 : vector<4x1xf32> to vector<4x128xf32>
    %59 = vector.broadcast %57 : vector<1x128xf32> to vector<4x128xf32>
    %60 = arith.mulf %58, %59 : vector<4x128xf32>
    %61 = arith.addf %55, %60 : vector<4x128xf32>
    %cst_4 = arith.constant 0.000000e+00 : f32
    %62 = vector.broadcast %cst_4 : f32 to vector<4x128xf32>
    %63 = arith.maximumf %61, %62 : vector<4x128xf32>
    %64 = vector.extract_strided_slice %6 {offsets = [0, 0], sizes = [1, 1], strides = [1, 1]} : vector<1x4xf32> to vector<1x1xf32>
    %65 = vector.extract_strided_slice %63 {offsets = [0, 0], sizes = [1, 128], strides = [1, 1]} : vector<4x128xf32> to vector<1x128xf32>
    %66 = vector.broadcast %64 : vector<1x1xf32> to vector<1x128xf32>
    %67 = arith.mulf %66, %65 : vector<1x128xf32>
    %68 = vector.broadcast %7 : vector<1x1xf32> to vector<1x128xf32>
    %69 = arith.addf %68, %67 : vector<1x128xf32>
    %70 = vector.extract_strided_slice %6 {offsets = [0, 1], sizes = [1, 1], strides = [1, 1]} : vector<1x4xf32> to vector<1x1xf32>
    %71 = vector.extract_strided_slice %63 {offsets = [1, 0], sizes = [1, 128], strides = [1, 1]} : vector<4x128xf32> to vector<1x128xf32>
    %72 = vector.broadcast %70 : vector<1x1xf32> to vector<1x128xf32>
    %73 = arith.mulf %72, %71 : vector<1x128xf32>
    %74 = arith.addf %69, %73 : vector<1x128xf32>
    %75 = vector.extract_strided_slice %6 {offsets = [0, 2], sizes = [1, 1], strides = [1, 1]} : vector<1x4xf32> to vector<1x1xf32>
    %76 = vector.extract_strided_slice %63 {offsets = [2, 0], sizes = [1, 128], strides = [1, 1]} : vector<4x128xf32> to vector<1x128xf32>
    %77 = vector.broadcast %75 : vector<1x1xf32> to vector<1x128xf32>
    %78 = arith.mulf %77, %76 : vector<1x128xf32>
    %79 = arith.addf %74, %78 : vector<1x128xf32>
    %80 = vector.extract_strided_slice %6 {offsets = [0, 3], sizes = [1, 1], strides = [1, 1]} : vector<1x4xf32> to vector<1x1xf32>
    %81 = vector.extract_strided_slice %63 {offsets = [3, 0], sizes = [1, 128], strides = [1, 1]} : vector<4x128xf32> to vector<1x128xf32>
    %82 = vector.broadcast %80 : vector<1x1xf32> to vector<1x128xf32>
    %83 = arith.mulf %82, %81 : vector<1x128xf32>
    %84 = arith.addf %79, %83 : vector<1x128xf32>
    %85 = arith.negf %84 : vector<1x128xf32>
    %86 = math.exp %85 : vector<1x128xf32>
    %cst_5 = arith.constant 1.000000e+00 : f32
    %87 = vector.broadcast %cst_5 : f32 to vector<1x128xf32>
    %88 = arith.addf %87, %86 : vector<1x128xf32>
    %89 = arith.divf %87, %88 : vector<1x128xf32>
    %c0_6 = arith.constant 0 : index
    %c0_7 = arith.constant 0 : index
    %90 = vector.load %arg3[%c0_6, %c0_7] : memref<1x128xf32, #tpu.memory_space<vmem>>, vector<1x128xf32>
    tpu.vector_store %arg3[%c0_6, %c0_7], %89 {strides = array<i32>} : memref<1x128xf32, #tpu.memory_space<vmem>>, vector<1x128xf32>,
    return
  }
  func.func @transform_0(%arg0: i32) -> (i32, i32) {
    %c0_i32 = arith.constant 0 : i32
    %c0_i32_0 = arith.constant 0 : i32
    return %c0_i32, %arg0 : i32, i32
  }
  func.func @transform_1(%arg0: i32) -> (i32, i32) {
    %c0_i32 = arith.constant 0 : i32
    %c0_i32_0 = arith.constant 0 : i32
    %c0_i32_1 = arith.constant 0 : i32
    return %c0_i32, %c0_i32_0 : i32, i32
  }
  func.func @transform_2(%arg0: i32) -> (i32, i32) {
    %c0_i32 = arith.constant 0 : i32
    %c0_i32_0 = arith.constant 0 : i32
    return %c0_i32, %arg0 : i32, i32
  }
}

</mosaic_0001>

<bundles_post_ra>
// kernel: tpu_custom_call.1
= control target key start
LH: loop header
LB: loop body
LE: loop exit
PB: predicated region body
PF: predicated region fallthrough
CT: control target
= control target key end

     0   :  { %7 = vsyncpa [#allocation3], 0  ;;  %s474_s0 = inlined_call_operand.hbm [shape: f32[12,128], index: 0, kind: input, shape index: {}]   ;;  %s475_s1 = inlined_call_operand.hbm [shape: f32[8,128], index: 1, kind: input, shape index: {}]   ;;  %s476_s2 = inlined_call_operand.hbm [shape: f32[1,128], index: 2, kind: output, shape index: {}]  }
   0x1   :  { %8 = vsyncpa [#allocation6], 0 }
   0x2   :  { %9 = vsyncpa [#allocation4], 0  ;;  %s399_s9 = smov [#allocation2]   ;;  %s327_s13 = scalar_lea.hbm %s474_s0, 256 }
   0x3   :  { %s15_s10 = sshll.u32 %s399_s9, 4  ;;  %p328_p0 = scmp.ne.s32.totalorder %s474_s0, %s327_s13  ;;  %s16_s10 = int_to_ptr.vmem [resolvable:$true] %s15_s10 }
   0x4   :  { %p331_p1 = scmp.lt.u32.totalorder %s327_s13, %s474_s0 }
   0x6   :  { %p333_p2 = pnand %p331_p1, %p328_p0 }
   0x8   :  { %336 = shalt.err (!%p333_p2)
}
   0x9   :  { %s337_s18 = scalar_lea.vmem %s16_s10, 256  ;;  %p342_p4 = scmp.lt.s32.totalorder %s16_s10, %s16_s10 }
   0xa   :  { %p338_p3 = scmp.ne.s32.totalorder %s16_s10, %s337_s18  ;;  %p343_p5 = scmp.lt.s32.totalorder %s337_s18, %s337_s18 }
   0xc   :  { %p344_p6 = por %p343_p5, %p342_p4 }
   0xe   :  { %p345_p7 = pnand %p344_p6, %p338_p3 }
  0x10   :  { %348 = shalt.err (!%p345_p7)
}
  0x11   :  { %s400_s19 = smov 128   ;;  %s401_s20 = smov 8  }
  0x12   :  { %21 = dma.hbm_to_vmem [thread:$0]  %s474_s0, 256, %s16_s10, [#allocation3], %s400_s19, %s400_s19, %s401_s20  }
  0x13   :  { %s402_s23 = smov [#allocation5]   ;;  %s349_s27 = scalar_lea.hbm %s475_s1, 128 }
  0x14   :  { %s28_s24 = sshll.u32 %s402_s23, 4  ;;  %p350_p8 = scmp.ne.s32.totalorder %s475_s1, %s349_s27  ;;  %s29_s24 = int_to_ptr.vmem [resolvable:$true] %s28_s24 }
  0x15   :  { %p353_p9 = scmp.lt.u32.totalorder %s349_s27, %s475_s1 }
  0x17   :  { %p355_p10 = pnand %p353_p9, %p350_p8 }
  0x19   :  { %358 = shalt.err (!%p355_p10)
}
  0x1a   :  { %s359_s4 = scalar_lea.vmem %s29_s24, 128  ;;  %p364_p12 = scmp.lt.s32.totalorder %s29_s24, %s29_s24 }
  0x1b   :  { %p360_p11 = scmp.ne.s32.totalorder %s29_s24, %s359_s4  ;;  %p365_p13 = scmp.lt.s32.totalorder %s359_s4, %s359_s4 }
  0x1d   :  { %p366_p0 = por %p365_p13, %p364_p12 }
  0x1f   :  { %p367_p1 = pnand %p366_p0, %p360_p11 }
  0x21   :  { %370 = shalt.err (!%p367_p1)
}
  0x22   :  { %31 = dma.hbm_to_vmem [thread:$0]  %s475_s1, 128, %s29_s24, [#allocation6]  }
  0x23   :  { %393 = dma.done.wait [#allocation3], 256  }
  0x24   :  { %394 = vsyncadd [#allocation3], 4294967040 }
  0x25   :  { %395 = dma.done.wait [#allocation6], 128  }
  0x26   :  { %396 = vsyncadd [#allocation6], 4294967168  ;;  %v403_v0 = vmov 0.0|0.0   ;;  %vm404_vm0 = vmmov 0   ;;  %v405_v1 = vmov 0.0   ;;  %v406_v2 = vmov 21  }
  0x27   :  { %280 = vmatprep.subr.bf16.mxu0 %v403_v0  ;;  %277 = vmatprep.mubr.msk.f32.mxu0 %vm404_vm0, %v405_v1  ;;  %vm49_vm1 = vcmask 1043456   ;;  %v407_v3 = vmov 12   ;;  %vm408_vm2 = vmmov 1   ;;  %v40_v4 = vld [vmem:[#allocation5] sm:$0xff]  ;;  %v38_v5 = vld [vmem:[#allocation2] sm:$0xff]  ;;  %vm46_vm4 = vcmask 97280  }
  0x28   :  { %310 = vset.pattern.permute.xlu1 %v406_v2  ;;  %308 = vset.pattern.permute.xlu0 %v407_v3  ;;  %vm282_vm3 = vmpackc.low %vm49_vm1, %vm408_vm2  ;;  %v39_v6 = vld [vmem:[#allocation2 + $0x8] sm:$0xf]  ;;  %v409_v8 = vmov 14   ;;  %v410_v9 = vmov 13   ;;  %v411_v10 = vmov 15   ;;  %v412_v11 = vmov 16  }
  0x29   :  { %v281_v7 = vpack.c.bf16 %v39_v6, %v38_v5  ;;  %134 = vperm.xlu1 %310, %v40_v4   ;;  %43 = vperm.xlu0 %308, %v40_v4   ;;  %v413_v12 = vmov 17   ;;  %v414_v13 = vmov 19   ;;  %v415_v14 = vmov 18   ;;  %s422_s1 = smov [#allocation7]  }
  0x2a   :  { %v416_v15 = vmov 26   ;;  %v417_v16 = vmov 20   ;;  %v418_v17 = vmov 25   ;;  %v419_v18 = vmov 22   ;;  %s257_s6 = sshll.u32 %s422_s1, 4  ;;  %s258_s6 = int_to_ptr.vmem [resolvable:$true] %s257_s6 }
  0x2b   :  { %283 = vmatpush3.bf16.msk.msra.mxu0 %vm282_vm3, %v281_v7  ;;  %v420_v19 = vmov 23   ;;  %v421_v20 = vmov 24   ;;  %v128_v23 = vlaneseq  ;;  %s371_s7 = scalar_lea.vmem %s258_s6, 16  ;;  %s375_s8 = scalar_lea.vmem %s258_s6, 32 }
  0x2c   :  { %p372_p2 = scmp.ne.s32.totalorder %s258_s6, %s371_s7  ;;  %p376_p3 = scmp.lt.s32.totalorder %s258_s6, %s258_s6 }
  0x2d   :  { %311 = vset.pattern.permute.xlu1 %v409_v8  ;;  %309 = vset.pattern.permute.xlu0 %v410_v9  ;;  %v129_v25 = vshrl.u32 %v128_v23, 7  ;;  %p377_p4 = scmp.lt.s32.totalorder %s375_s8, %s371_s7 }
  0x2e   :  { %278 = vmatmul.mubr.msk.f32.vlgmr.msra.gmra.mrb[0].mxu0 %vm46_vm4, %v40_v4  ;;  %139 = vperm.xlu1 %311, %v40_v4  }
  0x2f   :  { %125 = vperm.xlu0 %309, %v40_v4   ;;  %v130_v31 = vsub.s32 0, %v129_v25  ;;  %v144_v32 = vsub.s32 1, %v129_v25  ;;  %v154_v34 = vsub.s32 2, %v129_v25  ;;  %v164_v36 = vsub.s32 3, %v129_v25  ;;  %p378_p5 = por %p377_p4, %p376_p3 }
  0x30   :  { %v174_v40 = vsub.s32 4, %v129_v25  ;;  %v184_v43 = vsub.s32 5, %v129_v25  ;;  %v194_v51 = vsub.s32 6, %v129_v25  ;;  %v204_v56 = vsub.s32 7, %v129_v25 }
  0x31   :  { %p379_p6 = pnand %p378_p5, %p372_p2 }
  0x32   :  { %312 = vset.pattern.permute.xlu1 %v411_v10 }
  0x33   :  { %149 = vperm.xlu1 %312, %v40_v4   ;;  %313 = vset.pattern.permute.xlu0 %v412_v11 }
  0x34   :  { %159 = vperm.xlu0 %313, %v40_v4  }
  0x37   :  { %314 = vset.pattern.permute.xlu1 %v413_v12 }
  0x38   :  { %169 = vperm.xlu1 %314, %v40_v4   ;;  %316 = vset.pattern.permute.xlu0 %v414_v13 }
  0x39   :  { %189 = vperm.xlu0 %316, %v40_v4  }
  0x3c   :  { %315 = vset.pattern.permute.xlu1 %v415_v14 }
  0x3d   :  { %179 = vperm.xlu1 %315, %v40_v4   ;;  %319 = vset.pattern.permute.xlu0 %v416_v15 }
  0x3e   :  { %215 = vperm.xlu0 %319, %v40_v4  }
  0x41   :  { %317 = vset.pattern.permute.xlu1 %v417_v16 }
  0x42   :  { %199 = vperm.xlu1 %317, %v40_v4   ;;  %322 = vset.pattern.permute.xlu0 %v418_v17 }
  0x43   :  { %237 = vperm.xlu0 %322, %v40_v4  }
  0x46   :  { %318 = vset.pattern.permute.xlu1 %v419_v18 }
  0x47   :  { %210 = vperm.xlu1 %318, %v40_v4  }
  0x4b   :  { %320 = vset.pattern.permute.xlu1 %v420_v19 }
  0x4c   :  { %220 = vperm.xlu1 %320, %v40_v4  }
  0x50   :  { %321 = vset.pattern.permute.xlu1 %v421_v20 }
  0x51   :  { %229 = vperm.xlu1 %321, %v40_v4  }
  0xa8   :  { %v135_v21 = vpop.permute.xlu1 %134  ;;  %v44_v26 = vpop.permute.xlu0 %43 }
  0xad   :  { %v140_v22 = vpop.permute.xlu1 %139 }
  0xae   :  { %v126_v35 = vpop.permute.xlu0 %125 }
  0xb2   :  { %v150_v24 = vpop.permute.xlu1 %149 }
  0xb3   :  { %v160_v47 = vpop.permute.xlu0 %159 }
  0xb7   :  { %v170_v27 = vpop.permute.xlu1 %169 }
  0xb8   :  { %v190_v60 = vpop.permute.xlu0 %189 }
  0xbc   :  { %v180_v39 = vpop.permute.xlu1 %179 }
  0xbd   :  { %v216_v7 = vpop.permute.xlu0 %215 }
  0xc1   :  { %v200_v52 = vpop.permute.xlu1 %199 }
  0xc2   :  { %v238_v16 = vpop.permute.xlu0 %237 }
  0xc6   :  { %v211_v61 = vpop.permute.xlu1 %210 }
  0xcb   :  { %v221_v5 = vpop.permute.xlu1 %220 }
  0xd0   :  { %v230_v12 = vpop.permute.xlu1 %229 }
 0x101   :  { %v119_v28 = vpop.f32.mrb[0].mxu0 }
 0x102   :  { %v120_v29 = vadd.f32 %v119_v28, %v44_v26  ;;  %v279_v30 = vpop.f32.mrb[1].mxu0 }
 0x104   :  { %v123_v33 = vmax.f32 %v120_v29, 0.0 }
 0x106   :  { %v131_v37 = vrot.slane %v123_v33, %v130_v31  ;;  %v145_v38 = vrot.slane %v123_v33, %v144_v32  ;;  %v155_v42 = vrot.slane %v123_v33, %v154_v34  ;;  %v165_v46 = vrot.slane %v123_v33, %v164_v36 }
 0x107   :  { %v175_v50 = vrot.slane %v123_v33, %v174_v40  ;;  %v185_v53 = vrot.slane %v123_v33, %v184_v43  ;;  %v195_v59 = vrot.slane %v123_v33, %v194_v51  ;;  %v205_v0 = vrot.slane %v123_v33, %v204_v56 }
 0x108   :  { %v132_v41 = vmul.f32 %v131_v37, %v126_v35  ;;  %v146_v45 = vmul.f32 %v145_v38, %v140_v22  ;;  %v156_v49 = vmul.f32 %v155_v42, %v150_v24  ;;  %v166_v55 = vmul.f32 %v165_v46, %v160_v47 }
 0x109   :  { %v176_v58 = vmul.f32 %v175_v50, %v170_v27  ;;  %v186_v62 = vmul.f32 %v185_v53, %v180_v39  ;;  %v196_v2 = vmul.f32 %v195_v59, %v190_v60  ;;  %v206_v3 = vmul.f32 %v205_v0, %v200_v52 }
 0x10a   :  { %v137_v44 = vadd.f32 %v135_v21, %v132_v41 }
 0x10c   :  { %v147_v48 = vadd.f32 %v146_v45, %v137_v44 }
 0x10e   :  { %v157_v54 = vadd.f32 %v156_v49, %v147_v48 }
 0x110   :  { %v167_v57 = vadd.f32 %v166_v55, %v157_v54 }
 0x112   :  { %v177_v63 = vadd.f32 %v176_v58, %v167_v57 }
 0x114   :  { %v187_v1 = vadd.f32 %v186_v62, %v177_v63 }
 0x116   :  { %v197_v4 = vadd.f32 %v196_v2, %v187_v1 }
 0x118   :  { %v207_v6 = vadd.f32 %v206_v3, %v197_v4 }
 0x11a   :  { %v208_v8 = vmax.f32 %v207_v6, 0.0 }
 0x11c   :  { %v213_v9 = vmul.f32 %v211_v61, %v208_v8  ;;  %v224_v10 = vrot.slane %v208_v8, 1  ;;  %v232_v11 = vrot.slane %v208_v8, 2  ;;  %v240_v15 = vrot.slane %v208_v8, 3 }
 0x11e   :  { %v226_v13 = vmul.f32 %v224_v10, %v221_v5  ;;  %v218_v14 = vadd.f32 %v216_v7, %v213_v9  ;;  %v234_v18 = vmul.f32 %v232_v11, %v230_v12  ;;  %v242_v20 = vmul.f32 %v240_v15, %v238_v16 }
 0x120   :  { %v227_v17 = vadd.f32 %v226_v13, %v218_v14 }
 0x122   :  { %v235_v19 = vadd.f32 %v234_v18, %v227_v17 }
 0x124   :  { %v243_v21 = vadd.f32 %v242_v20, %v235_v19 }
 0x126   :  { %v269_v22 = vmul.f32 -1.442695, %v243_v21 }
 0x128   :  { %323 = vpow2.f32 %v269_v22 }
 0x132   :  { %v324_v23 = vpop.eup %323 }
 0x133   :  { %v247_v24 = vadd.f32 1.0, %v324_v23 }
 0x135   :  { %325 = vrcp.f32 %v247_v24 }
 0x13f   :  { %v326_v25 = vpop.eup %325 }
 0x140   :  { %250 = vst [vmem:[#allocation7] sm:$0x1] %v326_v25 }
 0x141   :  { %382 = shalt.err (!%p379_p6)
}
 0x142   :  { %s383_s11 = scalar_lea.hbm %s476_s2, 16 }
 0x143   :  { %p384_p7 = scmp.ne.s32.totalorder %s476_s2, %s383_s11  ;;  %p387_p8 = scmp.lt.u32.totalorder %s383_s11, %s476_s2 }
 0x145   :  { %p389_p9 = pnand %p387_p8, %p384_p7 }
 0x147   :  { %392 = shalt.err (!%p389_p9)
}
 0x148   :  { %260 = dma.vmem_to_hbm [thread:$0]  %s258_s6, 16, %s476_s2, [#allocation4]  }
 0x149   :  { %397 = dma.done.wait [#allocation4], 16  }
 0x14a   :  { %398 = vsyncadd [#allocation4], 4294967280 }
 0x14b   :  { %264 = vsyncpa [#allocation3], 1 }
 0x14c   :  { %265 = vsyncpa [#allocation6], 1 }
 0x14d   :  { %266 = vsyncpa [#allocation4], 1 }

</bundles_post_ra>
